<compile_context>
chip_gen: v5e
topology: v5e:2x2
jax: 0.10.0
libtpu: 0.0.40
codegen_flags: <defaults>
</compile_context>

<pallas_src>
import jax
import jax.numpy as jnp
from jax.experimental import pallas as pl
from jax.experimental.pallas import tpu as pltpu


def _round_up(x, m):
    return ((x + m - 1) // m) * m


def _vmem_limit(footprint_bytes):
    # Footprint + generous slack for compiler scratch; capped well below the
    # 64 MiB physical VMEM of a v7x TensorCore (review: never cap at physical).
    return int(min(48 << 20, max(16 << 20, 2 * footprint_bytes)))


def _matmul_kernel(lhs_ref, rhs_ref, o_ref):
    # One lane-dense 2D MXU matmul per grid step; f32 accumulation.
    o_ref[...] = jnp.dot(
        lhs_ref[...], rhs_ref[...], preferred_element_type=jnp.float32
    ).astype(o_ref.dtype)


def _nconv_kron_path(x, A):
    """No-relayout path: (B, V*L) @ kron(A, I_L); zero extra HBM passes."""
    N, C, V, L = x.shape
    W = A.shape[1]
    B = N * C
    K = V * L
    Nw = W * L
    itemsize = jnp.dtype(x.dtype).itemsize

    x2 = x.reshape(B, K)                                   # free (contiguous dims)
    ae = jnp.kron(A, jnp.eye(L, dtype=A.dtype))            # (V*L, W*L), built once

    # Row tile: multiple of 8; target ~4 MiB per step but keep >= ~8 grid steps.
    if B <= 8:
        tb = B
    else:
        by_bytes = max(8, (((4 << 20) // max(K * itemsize, 1)) // 8) * 8)
        by_steps = _round_up(pl.cdiv(B, 8), 8)
        tb = min(max(8, min(by_bytes, by_steps)), B)

    footprint = K * Nw * itemsize + 2 * tb * (K + Nw) * itemsize
    out2 = pl.pallas_call(
        _matmul_kernel,
        out_shape=jax.ShapeDtypeStruct((B, Nw), x.dtype),
        grid_spec=pltpu.PrefetchScalarGridSpec(
            num_scalar_prefetch=0,
            grid=(pl.cdiv(B, tb),),                        # ragged last block: OOB writes dropped
            in_specs=[
                pl.BlockSpec((tb, K), lambda i: (i, 0)),   # lane-dense x row tile
                pl.BlockSpec((K, Nw), lambda i: (0, 0)),   # Ae resident in VMEM
            ],
            out_specs=pl.BlockSpec((tb, Nw), lambda i: (i, 0)),
        ),
        compiler_params=pltpu.CompilerParams(
            dimension_semantics=("parallel",),             # megacore sharding on v7x
            vmem_limit_bytes=_vmem_limit(footprint),
        ),
    )(x2, ae)
    return out2.reshape(N, C, W, L)                        # free


def _nconv_lane_dense_path(x, A):
    """Large-V*L path: lane-dense (W,V) @ (V, M) matmul, M = N*C*L on lanes."""
    N, C, V, L = x.shape
    W = A.shape[1]
    M = N * C * L
    itemsize = jnp.dtype(x.dtype).itemsize

    # TODO(synk): do this re-layout on-chip (XLU) instead of in XLA.
    x_t = jnp.transpose(x, (2, 0, 1, 3)).reshape(V, M)
    a_t = jnp.transpose(A)                                 # (W, V): stationary LHS, tiny one-time cost

    # Lane tile: multiple of 128, no jnp.pad; ~16 grid steps, capped at 64K lanes.
    tl = min(65536, max(2048, _round_up(pl.cdiv(M, 16), 512)))
    tl = _round_up(tl, 128)
    if tl >= M:
        tl = M                                             # full-dim block is always legal

    footprint = W * V * itemsize + 2 * tl * (V + W) * itemsize
    out_t = pl.pallas_call(
        _matmul_kernel,
        out_shape=jax.ShapeDtypeStruct((W, M), x.dtype),
        grid_spec=pltpu.PrefetchScalarGridSpec(
            num_scalar_prefetch=0,
            grid=(pl.cdiv(M, tl),),                        # ragged last lane block OK
            in_specs=[
                pl.BlockSpec((W, V), lambda j: (0, 0)),    # A^T resident in VMEM
                pl.BlockSpec((V, tl), lambda j: (0, j)),   # lane tile of x
            ],
            out_specs=pl.BlockSpec((W, tl), lambda j: (0, j)),
        ),
        compiler_params=pltpu.CompilerParams(
            dimension_semantics=("parallel",),
            vmem_limit_bytes=_vmem_limit(footprint),
        ),
    )(a_t, x_t)
    return out_t.reshape(W, N, C, L).transpose(1, 2, 0, 3)


def _use_kron_path(V, W, L, itemsize):
    ae_bytes = (V * L) * (W * L) * itemsize
    # Kron inflates MXU flops by L; only use it while still safely memory-bound
    # and while the (V*L, W*L) operand is comfortably VMEM-resident.
    mxu_flops_per_byte = (L * V * W) / (2.0 * (V + W))
    return ae_bytes <= (2 << 20) and mxu_flops_per_byte <= 128.0


@jax.jit
def nconv(x, A):
    """out = einsum('ncvl,vw->ncwl', x, A); same semantics as the PyTorch module."""
    N, C, V, L = x.shape
    V2, W = A.shape
    assert V == V2, "A's first dim must match x's node dim V"
    itemsize = jnp.dtype(x.dtype).itemsize
    if _use_kron_path(V, W, L, itemsize):
        return _nconv_kron_path(x, A)
    return _nconv_lane_dense_path(x, A)


if __name__ == "__main__":
    key = jax.random.PRNGKey(0)
    kx, ka, kx2, ka2 = jax.random.split(key, 4)

    # Small shapes consistent with the module's forward: batch=2, channels=4,
    # num_nodes V=16 (square adjacency), seq length L=16.  -> kron (no-relayout) path.
    N, C, V, L = 2, 4, 16, 16
    x = jax.random.normal(kx, (N, C, V, L), dtype=jnp.float32)
    A = jax.random.normal(ka, (V, V), dtype=jnp.float32)
    out = jax.block_until_ready(nconv(x, A))
    ref = jnp.einsum("ncvl,vw->ncwl", x, A)
    assert out.shape == (N, C, V, L)
    assert jnp.allclose(out, ref, atol=1e-4, rtol=1e-4)

    # Larger node count -> exercises the lane-dense fallback path.
    N2, C2, V2, L2 = 2, 2, 128, 8
    x2 = jax.random.normal(kx2, (N2, C2, V2, L2), dtype=jnp.float32)
    A2 = jax.random.normal(ka2, (V2, V2), dtype=jnp.float32)
    out2 = jax.block_until_ready(nconv(x2, A2))
    ref2 = jnp.einsum("ncvl,vw->ncwl", x2, A2)
    assert out2.shape == (N2, C2, V2, L2)
    assert jnp.allclose(out2, ref2, atol=1e-3, rtol=1e-3)

    print("KERNEL_OK")
</pallas_src>

<mosaic_0001>
module attributes {stable_mosaic.version = 11 : i64} {
  func.func @_matmul_kernel(%arg0: i32, %arg1: memref<8x256xf32, #tpu.memory_space<vmem>>, %arg2: memref<256x256xf32, #tpu.memory_space<vmem>>, %arg3: memref<8x256xf32, #tpu.memory_space<vmem>>) attributes {dimension_semantics = [#tpu.dimension_semantics<parallel>], iteration_bounds = array<i64: 1>, scalar_prefetch = 0 : i64, scratch_operands = 0 : i64, tpu.core_type = #tpu.core_type<tc>, window_params = [{transform_indices = @transform_0, window_bounds = array<i64: 8, 256>}, {pipeline_mode = #tpu.pipeline_mode<synchronous>, transform_indices = @transform_1, window_bounds = array<i64: 256, 256>}, {transform_indices = @transform_2, window_bounds = array<i64: 8, 256>}]} {
    %c0 = arith.constant 0 : index
    %c0_0 = arith.constant 0 : index
    %0 = vector.load %arg1[%c0, %c0_0] : memref<8x256xf32, #tpu.memory_space<vmem>>, vector<8x256xf32>
    %c0_1 = arith.constant 0 : index
    %c0_2 = arith.constant 0 : index
    %1 = vector.load %arg2[%c0_1, %c0_2] : memref<256x256xf32, #tpu.memory_space<vmem>>, vector<256x256xf32>
    %cst = arith.constant dense<0.000000e+00> : vector<8x256xf32>
    %2 = tpu.matmul %0, %1, %cst {dimension_numbers = #tpu.dot_dimension_numbers<[1], [0], [0], [1], [0, 0, 1, 1], [], []>} : vector<8x256xf32>, vector<256x256xf32>, vector<8x256xf32> -> vector<8x256xf32>
    %c0_3 = arith.constant 0 : index
    %c0_4 = arith.constant 0 : index
    %3 = vector.load %arg3[%c0_3, %c0_4] : memref<8x256xf32, #tpu.memory_space<vmem>>, vector<8x256xf32>
    tpu.vector_store %arg3[%c0_3, %c0_4], %2 {strides = array<i32>} : memref<8x256xf32, #tpu.memory_space<vmem>>, vector<8x256xf32>,
    return
  }
  func.func @transform_0(%arg0: i32) -> (i32, i32) {
    %c0_i32 = arith.constant 0 : i32
    %c0_i32_0 = arith.constant 0 : i32
    return %arg0, %c0_i32 : i32, i32
  }
  func.func @transform_1(%arg0: i32) -> (i32, i32) {
    %c0_i32 = arith.constant 0 : i32
    %c0_i32_0 = arith.constant 0 : i32
    %c0_i32_1 = arith.constant 0 : i32
    return %c0_i32, %c0_i32_0 : i32, i32
  }
  func.func @transform_2(%arg0: i32) -> (i32, i32) {
    %c0_i32 = arith.constant 0 : i32
    %c0_i32_0 = arith.constant 0 : i32
    return %arg0, %c0_i32 : i32, i32
  }
}

</mosaic_0001>

<bundles_post_ra>
// kernel: nconv.1
= control target key start
LH: loop header
LB: loop body
LE: loop exit
PB: predicated region body
PF: predicated region fallthrough
CT: control target
= control target key end

     0   :  { %s382_s1 = inlined_call_operand.vmem [shape: f32[256,256], index: 1, kind: input, shape index: {}]   ;;  %s383_s0 = inlined_call_operand.vmem [shape: f32[8,256], index: 0, kind: input, shape index: {}]   ;;  %s384_s2 = inlined_call_operand.vmem [shape: f32[8,256], index: 2, kind: output, shape index: {}]  }
   0x1   :  { %v44_v0 = vld [vmem:[%s382_s1 + $0xf8] sm:$0xff]  ;;  %v42_v2 = vld [vmem:[%s382_s1 + $0xe8] sm:$0xff]  ;;  %v43_v6 = vld [vmem:[%s382_s1 + $0xf0] sm:$0xff] }
   0x2   :  { %v76_v1 = vld [vmem:[%s382_s1 + $0x1f8] sm:$0xff]  ;;  %117 = vmatpush.msra.mxu2 %v44_v0  ;;  %v74_v3 = vld [vmem:[%s382_s1 + $0x1e8] sm:$0xff]  ;;  %v75_v7 = vld [vmem:[%s382_s1 + $0x1f0] sm:$0xff]  ;;  %77 = vmatpush.msra.mxu0 %v43_v6 }
   0x3   :  { %137 = vmatpush.msra.mxu3 %v76_v1  ;;  %v40_v4 = vld [vmem:[%s382_s1 + $0xd8] sm:$0xff]  ;;  %v41_v8 = vld [vmem:[%s382_s1 + $0xe0] sm:$0xff]  ;;  %97 = vmatpush.msra.mxu1 %v75_v7  ;;  %v38_v10 = vld [vmem:[%s382_s1 + $0xc8] sm:$0xff] }
   0x4   :  { %v72_v5 = vld [vmem:[%s382_s1 + $0x1d8] sm:$0xff]  ;;  %118 = vmatpush.msra.mxu2 %v42_v2  ;;  %v73_v9 = vld [vmem:[%s382_s1 + $0x1e0] sm:$0xff]  ;;  %v70_v11 = vld [vmem:[%s382_s1 + $0x1c8] sm:$0xff]  ;;  %78 = vmatpush.msra.mxu0 %v41_v8 }
   0x5   :  { %138 = vmatpush.msra.mxu3 %v74_v3  ;;  %v39_v12 = vld [vmem:[%s382_s1 + $0xd0] sm:$0xff]  ;;  %98 = vmatpush.msra.mxu1 %v73_v9  ;;  %v36_v14 = vld [vmem:[%s382_s1 + $0xb8] sm:$0xff]  ;;  %v37_v16 = vld [vmem:[%s382_s1 + $0xc0] sm:$0xff] }
   0x6   :  { %119 = vmatpush.msra.mxu2 %v40_v4  ;;  %v71_v13 = vld [vmem:[%s382_s1 + $0x1d0] sm:$0xff]  ;;  %v68_v15 = vld [vmem:[%s382_s1 + $0x1b8] sm:$0xff]  ;;  %v69_v17 = vld [vmem:[%s382_s1 + $0x1c0] sm:$0xff]  ;;  %79 = vmatpush.msra.mxu0 %v39_v12 }
   0x7   :  { %139 = vmatpush.msra.mxu3 %v72_v5  ;;  %99 = vmatpush.msra.mxu1 %v71_v13  ;;  %v34_v18 = vld [vmem:[%s382_s1 + $0xa8] sm:$0xff]  ;;  %v35_v20 = vld [vmem:[%s382_s1 + $0xb0] sm:$0xff]  ;;  %v32_v22 = vld [vmem:[%s382_s1 + $0x98] sm:$0xff] }
   0x8   :  { %120 = vmatpush.msra.mxu2 %v38_v10  ;;  %v66_v19 = vld [vmem:[%s382_s1 + $0x1a8] sm:$0xff]  ;;  %v67_v21 = vld [vmem:[%s382_s1 + $0x1b0] sm:$0xff]  ;;  %80 = vmatpush.msra.mxu0 %v37_v16  ;;  %v64_v23 = vld [vmem:[%s382_s1 + $0x198] sm:$0xff] }
   0x9   :  { %140 = vmatpush.msra.mxu3 %v70_v11  ;;  %100 = vmatpush.msra.mxu1 %v69_v17  ;;  %v33_v24 = vld [vmem:[%s382_s1 + $0xa0] sm:$0xff]  ;;  %v30_v26 = vld [vmem:[%s382_s1 + $0x88] sm:$0xff]  ;;  %v31_v28 = vld [vmem:[%s382_s1 + $0x90] sm:$0xff] }
   0xa   :  { %121 = vmatpush.msra.mxu2 %v36_v14  ;;  %v65_v25 = vld [vmem:[%s382_s1 + $0x1a0] sm:$0xff]  ;;  %81 = vmatpush.msra.mxu0 %v35_v20  ;;  %v62_v27 = vld [vmem:[%s382_s1 + $0x188] sm:$0xff]  ;;  %v63_v29 = vld [vmem:[%s382_s1 + $0x190] sm:$0xff] }
   0xb   :  { %141 = vmatpush.msra.mxu3 %v68_v15  ;;  %101 = vmatpush.msra.mxu1 %v67_v21  ;;  %v28_v30 = vld [vmem:[%s382_s1 + $0x78] sm:$0xff]  ;;  %v29_v32 = vld [vmem:[%s382_s1 + $0x80] sm:$0xff]  ;;  %v26_v34 = vld [vmem:[%s382_s1 + $0x68] sm:$0xff] }
   0xc   :  { %122 = vmatpush.msra.mxu2 %v34_v18  ;;  %82 = vmatpush.msra.mxu0 %v33_v24  ;;  %v60_v31 = vld [vmem:[%s382_s1 + $0x178] sm:$0xff]  ;;  %v61_v33 = vld [vmem:[%s382_s1 + $0x180] sm:$0xff]  ;;  %v58_v35 = vld [vmem:[%s382_s1 + $0x168] sm:$0xff] }
   0xd   :  { %142 = vmatpush.msra.mxu3 %v66_v19  ;;  %102 = vmatpush.msra.mxu1 %v65_v25  ;;  %v27_v36 = vld [vmem:[%s382_s1 + $0x70] sm:$0xff]  ;;  %v24_v38 = vld [vmem:[%s382_s1 + $0x58] sm:$0xff]  ;;  %v25_v40 = vld [vmem:[%s382_s1 + $0x60] sm:$0xff] }
   0xe   :  { %123 = vmatpush.msra.mxu2 %v32_v22  ;;  %83 = vmatpush.msra.mxu0 %v31_v28  ;;  %v59_v37 = vld [vmem:[%s382_s1 + $0x170] sm:$0xff]  ;;  %v56_v39 = vld [vmem:[%s382_s1 + $0x158] sm:$0xff]  ;;  %v57_v41 = vld [vmem:[%s382_s1 + $0x160] sm:$0xff] }
   0xf   :  { %143 = vmatpush.msra.mxu3 %v64_v23  ;;  %103 = vmatpush.msra.mxu1 %v63_v29  ;;  %v22_v42 = vld [vmem:[%s382_s1 + $0x48] sm:$0xff]  ;;  %v23_v44 = vld [vmem:[%s382_s1 + $0x50] sm:$0xff]  ;;  %v20_v46 = vld [vmem:[%s382_s1 + $0x38] sm:$0xff] }
  0x10   :  { %124 = vmatpush.msra.mxu2 %v30_v26  ;;  %84 = vmatpush.msra.mxu0 %v29_v32  ;;  %v54_v43 = vld [vmem:[%s382_s1 + $0x148] sm:$0xff]  ;;  %v55_v45 = vld [vmem:[%s382_s1 + $0x150] sm:$0xff]  ;;  %v52_v47 = vld [vmem:[%s382_s1 + $0x138] sm:$0xff] }
  0x11   :  { %144 = vmatpush.msra.mxu3 %v62_v27  ;;  %104 = vmatpush.msra.mxu1 %v61_v33  ;;  %v21_v48 = vld [vmem:[%s382_s1 + $0x40] sm:$0xff]  ;;  %v18_v50 = vld [vmem:[%s382_s1 + $0x28] sm:$0xff]  ;;  %v19_v52 = vld [vmem:[%s382_s1 + $0x30] sm:$0xff] }
  0x12   :  { %125 = vmatpush.msra.mxu2 %v28_v30  ;;  %85 = vmatpush.msra.mxu0 %v27_v36  ;;  %v53_v49 = vld [vmem:[%s382_s1 + $0x140] sm:$0xff]  ;;  %v50_v51 = vld [vmem:[%s382_s1 + $0x128] sm:$0xff]  ;;  %v51_v53 = vld [vmem:[%s382_s1 + $0x130] sm:$0xff] }
  0x13   :  { %145 = vmatpush.msra.mxu3 %v60_v31  ;;  %105 = vmatpush.msra.mxu1 %v59_v37  ;;  %v16_v54 = vld [vmem:[%s382_s1 + $0x18] sm:$0xff]  ;;  %v17_v56 = vld [vmem:[%s382_s1 + $0x20] sm:$0xff]  ;;  %v14_v58 = vld [vmem:[%s382_s1 + $0x8] sm:$0xff] }
  0x14   :  { %126 = vmatpush.msra.mxu2 %v26_v34  ;;  %86 = vmatpush.msra.mxu0 %v25_v40  ;;  %v48_v55 = vld [vmem:[%s382_s1 + $0x118] sm:$0xff]  ;;  %v49_v57 = vld [vmem:[%s382_s1 + $0x120] sm:$0xff]  ;;  %v46_v59 = vld [vmem:[%s382_s1 + $0x108] sm:$0xff] }
  0x15   :  { %146 = vmatpush.msra.mxu3 %v58_v35  ;;  %106 = vmatpush.msra.mxu1 %v57_v41  ;;  %v11_v60 = vld [vmem:[%s383_s0] sm:$0xff]  ;;  %v12_v61 = vld [vmem:[%s383_s0 + $0x8] sm:$0xff]  ;;  %v15_v62 = vld [vmem:[%s382_s1 + $0x10] sm:$0xff] }
  0x16   :  { %127 = vmatpush.msra.mxu2 %v24_v38  ;;  %87 = vmatpush.msra.mxu0 %v23_v44  ;;  %v47_v63 = vld [vmem:[%s382_s1 + $0x110] sm:$0xff]  ;;  %v13_v0 = vld [vmem:[%s382_s1] sm:$0xff] }
  0x17   :  { %147 = vmatpush.msra.mxu3 %v56_v39  ;;  %107 = vmatpush.msra.mxu1 %v55_v45  ;;  %v45_v1 = vld [vmem:[%s382_s1 + $0x100] sm:$0xff] }
  0x18   :  { %128 = vmatpush.msra.mxu2 %v22_v42  ;;  %88 = vmatpush.msra.mxu0 %v21_v48 }
  0x19   :  { %148 = vmatpush.msra.mxu3 %v54_v43  ;;  %108 = vmatpush.msra.mxu1 %v53_v49 }
  0x1a   :  { %129 = vmatpush.msra.mxu2 %v20_v46  ;;  %89 = vmatpush.msra.mxu0 %v19_v52 }
  0x1b   :  { %149 = vmatpush.msra.mxu3 %v52_v47  ;;  %109 = vmatpush.msra.mxu1 %v51_v53 }
  0x1c   :  { %130 = vmatpush.msra.mxu2 %v18_v50  ;;  %90 = vmatpush.msra.mxu0 %v17_v56 }
  0x1d   :  { %150 = vmatpush.msra.mxu3 %v50_v51  ;;  %110 = vmatpush.msra.mxu1 %v49_v57 }
  0x1e   :  { %131 = vmatpush.msra.mxu2 %v16_v54  ;;  %91 = vmatpush.msra.mxu0 %v15_v62 }
  0x1f   :  { %151 = vmatpush.msra.mxu3 %v48_v55  ;;  %111 = vmatpush.msra.mxu1 %v47_v63 }
  0x20   :  { %132 = vmatpush.msra.mxu2 %v14_v58  ;;  %92 = vmatpush.msra.mxu0 %v13_v0 }
  0x21   :  { %152 = vmatpush.msra.mxu3 %v46_v59  ;;  %133 = vmatmul.f32.vlgmr.msra.gmra.mxu2 %v11_v60 }
  0x22   :  { %153 = vmatmul.f32.vlgmr.msra.gmra.mxu3 %v12_v61  ;;  %112 = vmatpush.msra.mxu1 %v45_v1 }
  0x23   :  { %93 = vmatmul.f32.vlgmr.msra.gmra.mxu0 %v11_v60  ;;  %113 = vmatmul.f32.vlgmr.msra.gmra.mxu1 %v12_v61 }
  0xa0   :  { %v94_v2 = vpop.f32.mrf.mxu0  ;;  %v114_v3 = vpop.f32.mrf.mxu1 }
  0xa1   :  { %v115_v4 = vadd.f32 %v114_v3, %v94_v2 }
  0xa3   :  { %157 = vst [vmem:[%s384_s2] sm:$0xff] %v115_v4 }
  0xa4   :  { %v134_v5 = vpop.f32.mrf.mxu2 }
  0xa5   :  { %v154_v6 = vpop.f32.mrf.mxu3 }
  0xa6   :  { %v155_v7 = vadd.f32 %v154_v6, %v134_v5 }
  0xa8   :  { %158 = vst [vmem:[%s384_s2 + $0x8] sm:$0xff] %v155_v7 }

</bundles_post_ra>
